<compile_context>
chip_gen: v5e
topology: v5e:2x2
jax: 0.10.0
libtpu: 0.0.40
codegen_flags: <defaults>
</compile_context>

<pallas_src>
import functools

import jax
import jax.numpy as jnp
from jax.experimental import pallas as pl
from jax.experimental.pallas import tpu as pltpu


LEAKY_SLOPE = 0.01
BN_EPS = 1e-5


def block_kernel(x_ref, w_ref, p_ref, o_ref):
    # x: (N, in)       -- resident across the whole (parallel) feature grid
    # w: (in, TILE_F)  -- pre-transposed, zero-padded weight tile
    # p: (8, TILE_F)   -- packed params, rows = [bias, gamma, beta, 0...]
    # o: (N, TILE_F)
    x = x_ref[...]
    w = w_ref[...]
    bias = p_ref[0:1, :]
    gamma = p_ref[1:2, :]
    beta = p_ref[2:3, :]

    # Linear: canonical contraction on the MXU, f32 accumulation.
    h = jnp.dot(x, w, preferred_element_type=jnp.float32) + bias

    # LeakyReLU (negative_slope = 0.01), cmp-free form.
    h = jnp.maximum(h, LEAKY_SLOPE * h)

    # One-pass BatchNorm1d statistics (training mode, biased variance):
    # sum and sum-of-squares are independent reductions; var from moments,
    # clamped at 0 against cancellation noise.
    inv_n = 1.0 / h.shape[0]
    mean = jnp.sum(h, axis=0, keepdims=True) * inv_n          # (1, TILE_F)
    ex2 = jnp.sum(h * h, axis=0, keepdims=True) * inv_n       # (1, TILE_F)
    var = jnp.maximum(ex2 - mean * mean, 0.0)

    # Fold affine + normalize into a single multiply-add pass over (N, TILE_F).
    scale = gamma * jax.lax.rsqrt(var + BN_EPS)               # (1, TILE_F)
    shift = beta - mean * scale                               # (1, TILE_F)
    o_ref[...] = (h * scale + shift).astype(o_ref.dtype)

    # TODO(synk): for very large N, compute the two column reductions as
    # ones-vector matmuls on the MXU and add an inner "arbitrary" batch grid
    # axis with VMEM sum/sumsq accumulators (inv_n must then use global N).


def prepare_block_params(weight, bias, gamma, beta):
    """One-time, call-invariant parameter prep.

    Do this at parameter-init time and reuse the result across calls; keeping
    it off the per-call hot path is the single biggest win at small shapes.
    Returns (wT_padded, packed_params, out_size, tile_f).
    """
    out_size, in_size = weight.shape
    out_p = ((out_size + 127) // 128) * 128           # lane-dense feature width
    tile_f = 256 if out_p % 256 == 0 else 128         # 256 fills v6e/v7x MXU

    # Pre-transposed, zero-padded weight: (in, out_p).
    wT = jnp.zeros((in_size, out_p), jnp.float32)
    wT = wT.at[:, :out_size].set(weight.T.astype(jnp.float32))

    # Pack bias / gamma / beta into a single sublane-padded (8, out_p) slab.
    params = jnp.zeros((8, out_p), jnp.float32)
    params = params.at[0, :out_size].set(bias.astype(jnp.float32))
    params = params.at[1, :out_size].set(gamma.astype(jnp.float32))
    params = params.at[2, :out_size].set(beta.astype(jnp.float32))

    return wT, params, out_size, tile_f


@functools.partial(jax.jit, static_argnames=("out_size", "tile_f"))
def block_apply(x, wT, params, out_size, tile_f):
    """Hot path: one pallas_call, gridded over feature tiles."""
    n, in_size = x.shape
    out_p = wT.shape[1]
    num_tiles = out_p // tile_f

    # TODO(synk): for non-toy sizes, cast x/wT to bf16 for the MXU feed (keep
    # f32 accumulation), use pl.Buffered(3) on the weight spec, and re-derive
    # the tile budget for v7x's 64 MiB VMEM (2*(N*in + in*TILE_F + N*TILE_F)*4B).
    out_padded = pl.pallas_call(
        block_kernel,
        out_shape=jax.ShapeDtypeStruct((n, out_p), x.dtype),
        grid=(num_tiles,),
        in_specs=[
            pl.BlockSpec((n, in_size), lambda j: (0, 0)),      # x resident
            pl.BlockSpec((in_size, tile_f), lambda j: (0, j)),  # weight tile
            pl.BlockSpec((8, tile_f), lambda j: (0, j)),        # packed params
        ],
        out_specs=pl.BlockSpec((n, tile_f), lambda j: (0, j)),
        compiler_params=pltpu.CompilerParams(
            dimension_semantics=("parallel",),   # feature tiles are independent
        ),
    )(x, wT, params)

    if out_p != out_size:
        return out_padded[:, :out_size]
    return out_padded


def block_forward(x, weight, bias, gamma, beta):
    """Convenience wrapper (prep + apply). Prefer caching prepare_block_params
    output and calling block_apply directly in a real training/inference loop."""
    wT, params, out_size, tile_f = prepare_block_params(weight, bias, gamma, beta)
    return block_apply(x, wT, params, out_size, tile_f)


def reference_forward(x, weight, bias, gamma, beta):
    h = x @ weight.T + bias
    h = jnp.where(h > 0, h, LEAKY_SLOPE * h)
    mean = jnp.mean(h, axis=0, keepdims=True)
    var = jnp.mean((h - mean) ** 2, axis=0, keepdims=True)
    return gamma * (h - mean) * jax.lax.rsqrt(var + BN_EPS) + beta


def _make_inputs(key, batch, input_size, output_size):
    kx, kw, kb = jax.random.split(key, 3)
    x = jax.random.normal(kx, (batch, input_size), dtype=jnp.float32)
    bound = 1.0 / (input_size ** 0.5)
    weight = jax.random.uniform(
        kw, (output_size, input_size), minval=-bound, maxval=bound, dtype=jnp.float32
    )
    bias = jax.random.uniform(
        kb, (output_size,), minval=-bound, maxval=bound, dtype=jnp.float32
    )
    gamma = jnp.ones((output_size,), dtype=jnp.float32)
    beta = jnp.zeros((output_size,), dtype=jnp.float32)
    return x, weight, bias, gamma, beta


if __name__ == "__main__":
    key = jax.random.PRNGKey(0)
    k1, k2 = jax.random.split(key)

    # Config A: small, non-multiple-of-128 output (pad + slice path, 1 tile).
    x, w, b, g, bt = _make_inputs(k1, batch=8, input_size=32, output_size=64)
    out = jax.block_until_ready(block_forward(x, w, b, g, bt))
    ref = reference_forward(x, w, b, g, bt)
    assert out.shape == (8, 64)
    assert jnp.allclose(out, ref, atol=1e-4, rtol=1e-4), "mismatch (config A)"

    # Config B: 128-aligned output exercising the feature grid (3 tiles, no slice).
    x2, w2, b2, g2, bt2 = _make_inputs(k2, batch=16, input_size=64, output_size=384)
    prepped = prepare_block_params(w2, b2, g2, bt2)        # hoisted, reusable
    out2 = jax.block_until_ready(block_apply(x2, *prepped))
    ref2 = reference_forward(x2, w2, b2, g2, bt2)
    assert out2.shape == (16, 384)
    assert jnp.allclose(out2, ref2, atol=1e-4, rtol=1e-4), "mismatch (config B)"

    # TODO(synk): BatchNorm1d running_mean/running_var momentum updates and the
    # nn.Dropout path (use_batch_norm=False) are not implemented here.

    print("KERNEL_OK")
</pallas_src>

<mosaic_0001>
module attributes {stable_mosaic.version = 11 : i64} {
  func.func @block_kernel(%arg0: i32, %arg1: memref<8x32xf32, #tpu.memory_space<vmem>>, %arg2: memref<32x128xf32, #tpu.memory_space<vmem>>, %arg3: memref<8x128xf32, #tpu.memory_space<vmem>>, %arg4: memref<8x128xf32, #tpu.memory_space<vmem>>) attributes {dimension_semantics = [#tpu.dimension_semantics<parallel>], iteration_bounds = array<i64: 1>, scalar_prefetch = 0 : i64, scratch_operands = 0 : i64, tpu.core_type = #tpu.core_type<tc>, window_params = [{pipeline_mode = #tpu.pipeline_mode<synchronous>, transform_indices = @transform_0, window_bounds = array<i64: 8, 32>}, {transform_indices = @transform_1, window_bounds = array<i64: 32, 128>}, {transform_indices = @transform_2, window_bounds = array<i64: 8, 128>}, {transform_indices = @transform_3, window_bounds = array<i64: 8, 128>}]} {
    %c0 = arith.constant 0 : index
    %c0_0 = arith.constant 0 : index
    %0 = vector.load %arg1[%c0, %c0_0] : memref<8x32xf32, #tpu.memory_space<vmem>>, vector<8x32xf32>
    %c0_1 = arith.constant 0 : index
    %c0_2 = arith.constant 0 : index
    %1 = vector.load %arg2[%c0_1, %c0_2] : memref<32x128xf32, #tpu.memory_space<vmem>>, vector<32x128xf32>
    %c0_3 = arith.constant 0 : index
    %c0_4 = arith.constant 0 : index
    %2 = vector.load %arg3[%c0_3, %c0_4] : memref<8x128xf32, #tpu.memory_space<vmem>>, vector<1x128xf32>
    %c1 = arith.constant 1 : index
    %c0_5 = arith.constant 0 : index
    %3 = vector.load %arg3[%c1, %c0_5] : memref<8x128xf32, #tpu.memory_space<vmem>>, vector<1x128xf32>
    %c2 = arith.constant 2 : index
    %c0_6 = arith.constant 0 : index
    %4 = vector.load %arg3[%c2, %c0_6] : memref<8x128xf32, #tpu.memory_space<vmem>>, vector<1x128xf32>
    %cst = arith.constant dense<0.000000e+00> : vector<8x128xf32>
    %5 = tpu.matmul %0, %1, %cst {dimension_numbers = #tpu.dot_dimension_numbers<[1], [0], [0], [1], [0, 0, 1, 1], [], []>} : vector<8x32xf32>, vector<32x128xf32>, vector<8x128xf32> -> vector<8x128xf32>
    %6 = vector.broadcast %2 : vector<1x128xf32> to vector<8x128xf32>
    %7 = arith.addf %5, %6 : vector<8x128xf32>
    %cst_7 = arith.constant 0.00999999977 : f32
    %8 = vector.broadcast %cst_7 : f32 to vector<8x128xf32>
    %9 = arith.mulf %8, %7 : vector<8x128xf32>
    %10 = arith.maximumf %7, %9 : vector<8x128xf32>
    %cst_8 = arith.constant dense<0.000000e+00> : vector<128xf32>
    %11 = vector.multi_reduction <add>, %10, %cst_8 [0] : vector<8x128xf32> to vector<128xf32>
    %12 = vector.shape_cast %11 : vector<128xf32> to vector<1x128xf32>
    %cst_9 = arith.constant 1.250000e-01 : f32
    %13 = vector.broadcast %cst_9 : f32 to vector<1x128xf32>
    %14 = arith.mulf %12, %13 : vector<1x128xf32>
    %15 = arith.mulf %10, %10 : vector<8x128xf32>
    %cst_10 = arith.constant dense<0.000000e+00> : vector<128xf32>
    %16 = vector.multi_reduction <add>, %15, %cst_10 [0] : vector<8x128xf32> to vector<128xf32>
    %17 = vector.shape_cast %16 : vector<128xf32> to vector<1x128xf32>
    %cst_11 = arith.constant 1.250000e-01 : f32
    %18 = vector.broadcast %cst_11 : f32 to vector<1x128xf32>
    %19 = arith.mulf %17, %18 : vector<1x128xf32>
    %20 = arith.mulf %14, %14 : vector<1x128xf32>
    %21 = arith.subf %19, %20 : vector<1x128xf32>
    %cst_12 = arith.constant 0.000000e+00 : f32
    %22 = vector.broadcast %cst_12 : f32 to vector<1x128xf32>
    %23 = arith.maximumf %21, %22 : vector<1x128xf32>
    %cst_13 = arith.constant 9.99999974E-6 : f32
    %24 = vector.broadcast %cst_13 : f32 to vector<1x128xf32>
    %25 = arith.addf %23, %24 : vector<1x128xf32>
    %26 = math.rsqrt %25 : vector<1x128xf32>
    %27 = arith.mulf %3, %26 : vector<1x128xf32>
    %28 = arith.mulf %14, %27 : vector<1x128xf32>
    %29 = arith.subf %4, %28 : vector<1x128xf32>
    %30 = vector.broadcast %27 : vector<1x128xf32> to vector<8x128xf32>
    %31 = arith.mulf %10, %30 : vector<8x128xf32>
    %32 = vector.broadcast %29 : vector<1x128xf32> to vector<8x128xf32>
    %33 = arith.addf %31, %32 : vector<8x128xf32>
    %c0_14 = arith.constant 0 : index
    %c0_15 = arith.constant 0 : index
    %34 = vector.load %arg4[%c0_14, %c0_15] : memref<8x128xf32, #tpu.memory_space<vmem>>, vector<8x128xf32>
    tpu.vector_store %arg4[%c0_14, %c0_15], %33 {strides = array<i32>} : memref<8x128xf32, #tpu.memory_space<vmem>>, vector<8x128xf32>,
    return
  }
  func.func @transform_0(%arg0: i32) -> (i32, i32) {
    %c0_i32 = arith.constant 0 : i32
    %c0_i32_0 = arith.constant 0 : i32
    %c0_i32_1 = arith.constant 0 : i32
    return %c0_i32, %c0_i32_0 : i32, i32
  }
  func.func @transform_1(%arg0: i32) -> (i32, i32) {
    %c0_i32 = arith.constant 0 : i32
    %c0_i32_0 = arith.constant 0 : i32
    return %c0_i32, %arg0 : i32, i32
  }
  func.func @transform_2(%arg0: i32) -> (i32, i32) {
    %c0_i32 = arith.constant 0 : i32
    %c0_i32_0 = arith.constant 0 : i32
    return %c0_i32, %arg0 : i32, i32
  }
  func.func @transform_3(%arg0: i32) -> (i32, i32) {
    %c0_i32 = arith.constant 0 : i32
    %c0_i32_0 = arith.constant 0 : i32
    return %c0_i32, %arg0 : i32, i32
  }
}

</mosaic_0001>

<bundles_post_ra>
// kernel: block_apply.1
= control target key start
LH: loop header
LB: loop body
LE: loop exit
PB: predicated region body
PF: predicated region fallthrough
CT: control target
= control target key end

     0   :  { %8 = vsyncpa [#allocation3], 0  ;;  %s298_s0 = inlined_call_operand.hbm [shape: f32[8,32], index: 0, kind: input, shape index: {}]   ;;  %s299_s1 = inlined_call_operand.hbm [shape: f32[32,128], index: 1, kind: input, shape index: {}]   ;;  %s300_s2 = inlined_call_operand.hbm [shape: f32[8,128], index: 2, kind: input, shape index: {}]   ;;  %s301_s3 = inlined_call_operand.hbm [shape: f32[8,128], index: 3, kind: output, shape index: {}]  }
   0x1   :  { %9 = vsyncpa [#allocation6], 0  ;;  %s26_s14 = sshll.u32 %s299_s1, 4  ;;  %s27_s14 = int_to_ptr.hbm [resolvable:$true] %s26_s14 }
   0x2   :  { %10 = vsyncpa [#allocation4], 0  ;;  %s260_s15 = smov [#allocation5]   ;;  %s16_s19 = sshll.u32 %s298_s0, 4  ;;  %s17_s19 = int_to_ptr.hbm [resolvable:$true] %s16_s19 }
   0x3   :  { %s28_s16 = sshll.u32 %s260_s15, 4  ;;  %s261_s20 = smov 128   ;;  %s29_s16 = int_to_ptr.vmem [resolvable:$true] %s28_s16 }
   0x4   :  { %s262_s21 = smov 8   ;;  %s263_s22 = smov [#allocation2]  }
   0x5   :  { %34 = dma.hbm_to_vmem [thread:$0]  %s27_s14, 512, %s29_s16, [#allocation6], %s261_s20, %s261_s20, %s262_s21  }
   0x6   :  { %s18_s23 = sshll.u32 %s263_s22, 4  ;;  %s40_s26 = sshll.u32 %s300_s2, 4  ;;  %s19_s23 = int_to_ptr.vmem [resolvable:$true] %s18_s23  ;;  %s41_s26 = int_to_ptr.hbm [resolvable:$true] %s40_s26 }
   0x7   :  { %21 = dma.hbm_to_vmem [thread:$0]  %s17_s19, 128, %s19_s23, [#allocation3]  }
   0x8   :  { %s264_s1 = smov [#allocation7]  }
   0x9   :  { %s42_s27 = sshll.u32 %s264_s1, 4  ;;  %s43_s27 = int_to_ptr.vmem [resolvable:$true] %s42_s27 }
   0xa   :  { %45 = dma.hbm_to_vmem [thread:$0]  %s41_s26, 128, %s43_s27, [#allocation6]  }
   0xb   :  { %254 = dma.done.wait [#allocation3], 128  }
   0xc   :  { %255 = vsyncadd [#allocation3], 4294967168 }
   0xd   :  { %256 = dma.done.wait [#allocation6], 640  }
   0xe   :  { %257 = vsyncadd [#allocation6], 4294966656  ;;  %v62_v0 = vld [vmem:[#allocation5 + $0x18] sm:$0xff]  ;;  %v61_v1 = vld [vmem:[#allocation5 + $0x10] sm:$0xff]  ;;  %vm67_vm0 = vcmask 261120   ;;  %s265_s0 = smov [#allocation8]  }
   0xf   :  { %83 = vmatpush.msra.mxu0 %v62_v0  ;;  %v60_v2 = vld [vmem:[#allocation5 + $0x8] sm:$0xff]  ;;  %v59_v3 = vld [vmem:[#allocation5] sm:$0xff]  ;;  %v58_v4 = vld [vmem:[#allocation2] sm:$0xff]  ;;  %s135_s2 = sshll.u32 %s265_s0, 4  ;;  %s137_s30 = sshll.u32 %s301_s3, 4  ;;  %s136_s2 = int_to_ptr.vmem [resolvable:$true] %s135_s2  ;;  %s138_s30 = int_to_ptr.hbm [resolvable:$true] %s137_s30 }
  0x10   :  { %v155_v5 = vld [vmem:[#allocation7] ss:$0 sm:$0xff]  ;;  %v64_v34 = vld [vmem:[#allocation7 + $0x1] sm:$0x1]  ;;  %v65_v38 = vld [vmem:[#allocation7 + $0x2] sm:$0x1] }
  0x11   :  { %84 = vmatpush.msra.mxu0 %v61_v1 }
  0x13   :  { %85 = vmatpush.msra.mxu0 %v60_v2 }
  0x15   :  { %86 = vmatpush.msra.mxu0 %v59_v3 }
  0x16   :  { %148 = vmatmul.msk.f32.vlgmr.msra.gmra.mxu0 %vm67_vm0, %v58_v4 }
  0x93   :  { %v88_v6 = vpop.f32.mrf.mxu0 }
  0x94   :  { %v89_v7 = vadd.f32 %v155_v5, %v88_v6 }
  0x96   :  { %v91_v8 = vmul.f32 0.01, %v89_v7 }
  0x98   :  { %v92_v9 = vmax.f32 %v89_v7, %v91_v8 }
  0x9a   :  { %v93_v10 = vrot.slane %v92_v9, 4  ;;  %v100_v11 = vmul.f32 %v92_v9, %v92_v9 }
  0x9c   :  { %v94_v12 = vadd.f32 %v93_v10, %v92_v9  ;;  %v101_v13 = vrot.slane %v100_v11, 4 }
  0x9e   :  { %v95_v14 = vrot.slane %v94_v12, 2  ;;  %v102_v15 = vadd.f32 %v101_v13, %v100_v11 }
  0xa0   :  { %v96_v16 = vadd.f32 %v95_v14, %v94_v12  ;;  %v103_v17 = vrot.slane %v102_v15, 2 }
  0xa2   :  { %v104_v18 = vadd.f32 %v103_v17, %v102_v15  ;;  %v97_v19 = vrot.slane %v96_v16, 1 }
  0xa4   :  { %v105_v20 = vrot.slane %v104_v18, 1  ;;  %v98_v21 = vadd.f32 %v97_v19, %v96_v16 }
  0xa6   :  { %v106_v22 = vadd.f32 %v105_v20, %v104_v18  ;;  %v99_v23 = vmul.f32 0.125, %v98_v21 }
  0xa8   :  { %v107_v24 = vmul.f32 0.125, %v106_v22  ;;  %v108_v25 = vmul.f32 %v99_v23, %v99_v23 }
  0xaa   :  { %v109_v26 = vsub.f32 %v107_v24, %v108_v25 }
  0xac   :  { %v110_v27 = vmax.f32 %v109_v26, 0.0 }
  0xae   :  { %v111_v28 = vadd.f32 1e-05, %v110_v27 }
  0xb0   :  { %156 = vrsqrt.f32 %v111_v28  ;;  %vm118_vm2 = vweird.f32 %v111_v28 }
  0xb6   :  { %v157_v29 = vpop.eup %156 }
  0xb7   :  { %v113_v30 = vmul.f32 %v157_v29, %v111_v28  ;;  %vm119_vm1 = vweird.f32 %v157_v29 }
  0xb8   :  { %vm120_vm3 = vmor %vm118_vm2, %vm119_vm1 }
  0xb9   :  { %v114_v31 = vmul.f32 %v157_v29, %v113_v30 }
  0xbb   :  { %v115_v32 = vmul.f32 0.5, %v114_v31 }
  0xbd   :  { %v116_v33 = vsub.f32 1.5, %v115_v32 }
  0xbf   :  { %v117_v35 = vmul.f32 %v157_v29, %v116_v33 }
  0xc1   :  { %v121_v36 = vsel %vm120_vm3, %v157_v29, %v117_v35 }
  0xc2   :  { %v122_v37 = vmul.f32 %v121_v36, %v64_v34 }
  0xc4   :  { %v123_v39 = vmul.f32 %v122_v37, %v99_v23  ;;  %v125_v40 = vperm.slane %v122_v37, 0 }
  0xc6   :  { %v124_v41 = vsub.f32 %v65_v38, %v123_v39  ;;  %v126_v42 = vmul.f32 %v125_v40, %v92_v9 }
  0xc8   :  { %v127_v43 = vperm.slane %v124_v41, 0 }
  0xca   :  { %v128_v44 = vadd.f32 %v127_v43, %v126_v42 }
  0xcc   :  { %129 = vst [vmem:[#allocation8] sm:$0xff] %v128_v44 }
  0xcd   :  { %140 = dma.vmem_to_hbm [thread:$0]  %s136_s2, 128, %s138_s30, [#allocation4]  }
  0xce   :  { %258 = dma.done.wait [#allocation4], 128  }
  0xcf   :  { %259 = vsyncadd [#allocation4], 4294967168 }
  0xd0   :  { %145 = vsyncpa [#allocation3], 1 }
  0xd1   :  { %146 = vsyncpa [#allocation6], 1 }
  0xd2   :  { %147 = vsyncpa [#allocation4], 1 }

</bundles_post_ra>
